<compile_context>
chip_gen: v7x
topology: tpu7x:2x2x1
jax: 0.10.0
libtpu: 0.0.40
codegen_flags: <defaults>
</compile_context>

<pallas_src>
import jax
import jax.numpy as jnp
from jax import lax
from jax.experimental import pallas as pl
from jax.experimental.pallas import tpu as pltpu


def _deepwalk_kernel(idx_ref, phi_hbm, phi2_ref, out_ref, hidden_ref, gather_sem):
    """Grid = (batch tiles i, vocab tiles j); j is the inner (arbitrary) axis.

    idx_ref   : (B,) int32 node ids in SMEM (scalar prefetch).
    phi_hbm   : (V, E) weights left in HBM (memory_space=pl.ANY).
    phi2_ref  : (E, TV) vocab tile of the output projection (VMEM).
    out_ref   : (TB, TV) output tile (VMEM).
    hidden_ref: (TB, E) persistent VMEM scratch holding the gathered phi rows.
    """
    i = pl.program_id(0)
    tb = hidden_ref.shape[0]

    @pl.when(pl.program_id(1) == 0)
    def _():
        # Gather the TB phi rows this batch tile needs straight from HBM into
        # the persistent hidden scratch: TB tiny row DMAs instead of a dense
        # (TB, V) mask matmul, and no phi residency in VMEM.
        def start_row(r, carry):
            node = idx_ref[i * tb + r]
            pltpu.make_async_copy(
                phi_hbm.at[pl.ds(node, 1), :],
                hidden_ref.at[pl.ds(r, 1), :],
                gather_sem,
            ).start()
            return carry

        lax.fori_loop(0, tb, start_row, 0)

        def wait_row(r, carry):
            # All copies are the same size, so waiting with an equivalent
            # descriptor TB times drains the shared DMA semaphore exactly.
            pltpu.make_async_copy(
                phi_hbm.at[pl.ds(0, 1), :],
                hidden_ref.at[pl.ds(0, 1), :],
                gather_sem,
            ).wait()
            return carry

        lax.fori_loop(0, tb, wait_row, 0)

    # (TB, E) @ (E, TV) -> (TB, TV) on the MXU, f32 accumulation.
    out_ref[...] = jnp.dot(
        hidden_ref[...], phi2_ref[...], preferred_element_type=jnp.float32
    ).astype(out_ref.dtype)


def _pick_tile(dim, cap, mults):
    """Largest multiple of one of `mults` <= cap that divides `dim`, else dim."""
    if dim <= cap:
        return dim
    for mult in mults:
        t = (cap // mult) * mult
        while t >= mult:
            if dim % t == 0:
                return t
            t -= mult
    return dim


def deepwalk_forward_idx(idx, phi, phi2, *, out_dtype=jnp.float32,
                         batch_tile=256, vocab_tile=2048):
    """Hot-loop API: out[b] = phi[idx[b]] @ phi2.

    `idx` are raw int node ids (DeepWalk walks already are node ids) and
    `phi` / `phi2` are expected pre-cast to the desired MXU dtype (bf16 pays
    on v6e/v7x; keep f32 on v5e).  Nothing is re-cast or re-read per call.
    """
    (B,) = idx.shape
    V, E = phi.shape
    assert phi2.shape == (E, V), "phi2 must be (E, V)"
    assert phi.dtype == phi2.dtype, "phi and phi2 must share a dtype"

    idx = idx.astype(jnp.int32)

    tb = _pick_tile(B, batch_tile, (256, 8))      # batch tile (sublane axis)
    tv = _pick_tile(V, vocab_tile, (256, 128))    # vocab tile (lane axis)
    grid = (B // tb, V // tv)

    w_bytes = jnp.dtype(phi.dtype).itemsize
    out_bytes = jnp.dtype(out_dtype).itemsize

    # Double-buffered out + phi2 tiles, plus the persistent hidden scratch.
    vmem_need = 2 * tb * tv * out_bytes + 2 * E * tv * w_bytes + tb * E * w_bytes
    vmem_limit = int(vmem_need + (8 << 20)) if vmem_need > (24 << 20) else None

    cost = pl.CostEstimate(
        flops=2 * B * E * V,
        transcendentals=0,
        bytes_accessed=(B * 4                       # node ids
                        + B * E * w_bytes           # gathered phi rows
                        + (B // tb) * E * V * w_bytes  # phi2 streamed per batch tile
                        + B * V * out_bytes),       # output
    )

    return pl.pallas_call(
        _deepwalk_kernel,
        out_shape=jax.ShapeDtypeStruct((B, V), out_dtype),
        grid_spec=pltpu.PrefetchScalarGridSpec(
            num_scalar_prefetch=1,
            grid=grid,
            in_specs=[
                pl.BlockSpec(memory_space=pl.ANY),                 # phi in HBM
                pl.BlockSpec((E, tv), lambda i, j, idx: (0, j)),   # phi2 tile
            ],
            out_specs=pl.BlockSpec((tb, tv), lambda i, j, idx: (i, j)),
            scratch_shapes=[
                pltpu.VMEM((tb, E), phi.dtype),      # gathered hidden rows
                pltpu.SemaphoreType.DMA(()),         # shared gather semaphore
            ],
        ),
        compiler_params=pltpu.CompilerParams(
            dimension_semantics=("parallel", "arbitrary"),
            vmem_limit_bytes=vmem_limit),
        cost_estimate=cost,
    )(idx, phi, phi2)


def deepwalk_forward(one_hot, phi, phi2, *, weight_dtype=None,
                     batch_tile=256, vocab_tile=2048):
    """Module-equivalent interface: (one_hot @ phi) @ phi2.

    Precondition: every row of `one_hot` is a strict one-hot vector (exactly
    one entry equal to 1).  Rows violating this change semantics (the gather
    picks the argmax row only).  For repeated calls prefer
    `deepwalk_forward_idx` with precomputed ids / pre-cast weights: the argmax
    below re-reads the dense B x V input and the casts re-stream both weight
    matrices every call.
    """
    B, V = one_hot.shape
    assert phi.shape[0] == V and phi2.shape == (phi.shape[1], V), "shape mismatch"
    if weight_dtype is not None:
        phi = phi.astype(weight_dtype)
        phi2 = phi2.astype(weight_dtype)
    idx = jnp.argmax(one_hot, axis=-1).astype(jnp.int32)
    return deepwalk_forward_idx(idx, phi, phi2, out_dtype=jnp.float32,
                                batch_tile=batch_tile, vocab_tile=vocab_tile)


def _mxu_weight_dtype():
    """bf16 weights pay off on v6e/v7x (256x256 MXU); keep f32 elsewhere (v5e)."""
    try:
        kind = jax.devices()[0].device_kind.lower()
    except Exception:
        return jnp.float32
    if ("v6" in kind) or ("v7" in kind) or ("7x" in kind):
        return jnp.bfloat16
    return jnp.float32


if __name__ == "__main__":
    size_vertex = 128      # V
    embedding_size = 32    # E
    batch = 512            # many walk steps batched per launch

    key = jax.random.PRNGKey(0)
    k_phi, k_phi2, k_idx = jax.random.split(key, 3)

    # torch.rand -> uniform [0, 1)
    phi = jax.random.uniform(k_phi, (size_vertex, embedding_size), dtype=jnp.float32)
    phi2 = jax.random.uniform(k_phi2, (embedding_size, size_vertex), dtype=jnp.float32)

    idx = jax.random.randint(k_idx, (batch,), 0, size_vertex)
    one_hot = jax.nn.one_hot(idx, size_vertex, dtype=jnp.float32)

    ref = (one_hot @ phi) @ phi2

    # f32 path with the module's one_hot interface: exact semantics.
    out = jax.block_until_ready(deepwalk_forward(one_hot, phi, phi2))
    assert out.shape == (batch, size_vertex)
    assert jnp.allclose(out, ref, atol=1e-5, rtol=1e-5)

    # Hot-loop index interface with a device-appropriate weight dtype
    # (bf16 on v6e/v7x, f32 on v5e and older).
    wdt = _mxu_weight_dtype()
    out2 = jax.block_until_ready(
        deepwalk_forward_idx(idx.astype(jnp.int32),
                             phi.astype(wdt), phi2.astype(wdt)))
    tol = 1e-5 if wdt == jnp.float32 else 5e-2
    assert jnp.allclose(out2.astype(jnp.float32), ref, atol=tol, rtol=tol)

    print("KERNEL_OK")
</pallas_src>

<mosaic_0001>
module attributes {stable_mosaic.version = 11 : i64} {
  func.func @_deepwalk_kernel(%arg0: i32, %arg1: i32, %arg2: memref<512xi32, #tpu.memory_space<smem>>, %arg3: memref<128x32xf32, #tpu.memory_space<any>>, %arg4: memref<32x128xf32, #tpu.memory_space<vmem>>, %arg5: memref<256x128xf32, #tpu.memory_space<vmem>>, %arg6: memref<256x32xf32, #tpu.memory_space<vmem>>, %arg7: memref<!tpu.dma_semaphore, #tpu.memory_space<semaphore_mem>>) attributes {dimension_semantics = [#tpu.dimension_semantics<parallel>, #tpu.dimension_semantics<arbitrary>], iteration_bounds = array<i64: 2, 1>, scalar_prefetch = 1 : i64, scratch_operands = 2 : i64, tpu.core_type = #tpu.core_type<tc>, window_params = [{}, {transform_indices = @transform_1, window_bounds = array<i64: 32, 128>}, {transform_indices = @transform_2, window_bounds = array<i64: 256, 128>}]} {
    %c0_i32 = arith.constant 0 : i32
    %0 = arith.cmpi eq, %arg1, %c0_i32 : i32
    %1 = arith.extui %0 : i1 to i32
    %c0_i32_0 = arith.constant 0 : i32
    %2 = arith.cmpi ne, %1, %c0_i32_0 : i32
    scf.if %2 {
      %c0_i32_6 = arith.constant 0 : i32
      %c256_i32 = arith.constant 256 : i32
      %7 = arith.addi %c0_i32_6, %c256_i32 : i32
      %c1_i32 = arith.constant 1 : i32
      scf.for %arg8 = %c0_i32_6 to %7 step %c1_i32  : i32 {
        %c256_i32_11 = arith.constant 256 : i32
        %9 = arith.muli %arg0, %c256_i32_11 : i32
        %10 = arith.addi %9, %arg8 : i32
        %11 = arith.index_cast %10 : i32 to index
        %12 = memref.load %arg2[%11] : memref<512xi32, #tpu.memory_space<smem>>
        %c0_i32_12 = arith.constant 0 : i32
        %13 = tpu.memref_slice %arg3[%12, %c0_i32_12] : memref<128x32xf32, #tpu.memory_space<any>> -> memref<1x32xf32, #tpu.memory_space<any>>
        %c0_i32_13 = arith.constant 0 : i32
        %14 = tpu.memref_slice %arg6[%arg8, %c0_i32_13] : memref<256x32xf32, #tpu.memory_space<vmem>> -> memref<1x32xf32, #tpu.memory_space<vmem>>
        tpu.enqueue_dma source(%13 : memref<1x32xf32, #tpu.memory_space<any>>) target(%14 : memref<1x32xf32, #tpu.memory_space<vmem>>) target_semaphore(%arg7 : memref<!tpu.dma_semaphore, #tpu.memory_space<semaphore_mem>>)
      }
      %c256_i32_7 = arith.constant 256 : i32
      %c0_i32_8 = arith.constant 0 : i32
      %c256_i32_9 = arith.constant 256 : i32
      %8 = arith.addi %c0_i32_8, %c256_i32_9 : i32
      %c1_i32_10 = arith.constant 1 : i32
      scf.for %arg8 = %c0_i32_8 to %8 step %c1_i32_10  : i32 {
        %c0_i32_11 = arith.constant 0 : i32
        %c0_i32_12 = arith.constant 0 : i32
        %9 = tpu.memref_slice %arg3[%c0_i32_11, %c0_i32_12] : memref<128x32xf32, #tpu.memory_space<any>> -> memref<1x32xf32, #tpu.memory_space<any>>
        %c0_i32_13 = arith.constant 0 : i32
        %c0_i32_14 = arith.constant 0 : i32
        %10 = tpu.memref_slice %arg6[%c0_i32_13, %c0_i32_14] : memref<256x32xf32, #tpu.memory_space<vmem>> -> memref<1x32xf32, #tpu.memory_space<vmem>>
        tpu.wait_dma2 semaphore(%arg7 : memref<!tpu.dma_semaphore, #tpu.memory_space<semaphore_mem>>) src(%9 : memref<1x32xf32, #tpu.memory_space<any>>) dst(%10 : memref<1x32xf32, #tpu.memory_space<vmem>>)
      }
    } else {
    }
    %c0 = arith.constant 0 : index
    %c0_1 = arith.constant 0 : index
    %3 = vector.load %arg6[%c0, %c0_1] : memref<256x32xf32, #tpu.memory_space<vmem>>, vector<256x32xf32>
    %c0_2 = arith.constant 0 : index
    %c0_3 = arith.constant 0 : index
    %4 = vector.load %arg4[%c0_2, %c0_3] : memref<32x128xf32, #tpu.memory_space<vmem>>, vector<32x128xf32>
    %cst = arith.constant dense<0.000000e+00> : vector<256x128xf32>
    %5 = tpu.matmul %3, %4, %cst {dimension_numbers = #tpu.dot_dimension_numbers<[1], [0], [0], [1], [0, 0, 1, 1], [], []>} : vector<256x32xf32>, vector<32x128xf32>, vector<256x128xf32> -> vector<256x128xf32>
    %c0_4 = arith.constant 0 : index
    %c0_5 = arith.constant 0 : index
    %6 = vector.load %arg5[%c0_4, %c0_5] : memref<256x128xf32, #tpu.memory_space<vmem>>, vector<256x128xf32>
    tpu.vector_store %arg5[%c0_4, %c0_5], %5 {strides = array<i32>} : memref<256x128xf32, #tpu.memory_space<vmem>>, vector<256x128xf32>,
    return
  }
  func.func @transform_1(%arg0: i32, %arg1: i32, %arg2: memref<512xi32, #tpu.memory_space<smem>>) -> (i32, i32) {
    %c0_i32 = arith.constant 0 : i32
    %c0_i32_0 = arith.constant 0 : i32
    return %c0_i32, %arg1 : i32, i32
  }
  func.func @transform_2(%arg0: i32, %arg1: i32, %arg2: memref<512xi32, #tpu.memory_space<smem>>) -> (i32, i32) {
    %c0_i32 = arith.constant 0 : i32
    return %arg0, %arg1 : i32, i32
  }
}

</mosaic_0001>

<bundles_post_ra>
// kernel: tpu_custom_call.1
= control target key start
LH: loop header
LB: loop body
LE: loop exit
PB: predicated region body
PF: predicated region fallthrough
CT: control target
= control target key end

     0   :  { %s1271_s0 = inlined_call_operand.vmem [shape: s32[512], index: 0, kind: input, shape index: {}]   ;;  %s1272_s1 = inlined_call_operand.vmem [shape: f32[128,32], index: 1, kind: input, shape index: {}]   ;;  %s1273_s2 = inlined_call_operand.vmem [shape: f32[32,128], index: 2, kind: input, shape index: {}]   ;;  %s1274_s3 = inlined_call_operand.hbm [shape: f32[512,128], index: 3, kind: output, shape index: {}]  }
   0x1   :  { %s8_s14 = sshll.u32 %s1271_s0, 4  ;;  %s9_s14 = int_to_ptr.vmem [resolvable:$true] %s8_s14 }
   0x2   :  { %s935_s15 = scalar_lea.vmem %s9_s14, 64  ;;  %p940_p1 = scmp.lt.s32.totalorder %s9_s14, %s9_s14 }
   0x3   :  { %p936_p0 = scmp.ne.s32.totalorder %s9_s14, %s935_s15  ;;  %p941_p2 = scmp.lt.s32.totalorder %s935_s15, %s935_s15 }
   0x5   :  { %p942_p3 = por %p941_p2, %p940_p1 }
   0x7   :  { %p943_p4 = pnand %p942_p3, %p936_p0 }
   0x9   :  { %946 = shalt.err (!%p943_p4)  }
   0xa   :  { %s1047_s16 = smov [#allocation5]  }
   0xb   :  { %11 = dma.vmem_to_smem %s9_s14, 64, %s1047_s16, [#allocation4] }
   0xc   :  { %1007 = dma.done.wait [#allocation4], 64 }
   0xd   :  { %1008 = vsyncadd [#allocation4], 4294967232 }
   0xe   :  { %13 = sfence }
   0xf   :  { %14 = vsyncpa [#allocation7], 0 }
  0x10   :  { %16 = vsyncpa [#allocation7 + $0x1], 0  ;;  %s1074_s17 = smov 0   ;;  %s1076_s18 = smov 0  }
  0x11   :  { %s1078_s0 = smov 0   ;;  %s1080_s19 = smov 0  }
  0x12   :  { %s1082_s20 = smov 0   ;;  %s1084_s21 = smov 0  }
  0x13 LB: > { %s711_s22 = sadd.s32 4294967295, %s1037_s21   ;;  %s712_s23 = sadd.s32 4294967294, %s1037_s21   ;;  %s1037_s21 = sphi %s1084_s21, %s22_s21   ;;  %s1033_s20 = sphi %s1082_s20, %s1281_s20   ;;  %s1029_s19 = sphi %s1080_s19, %s1280_s19   ;;  %s1025_s0 = sphi %s1078_s0, %s1279_s0   ;;  %s1021_s18 = sphi %s1076_s18, %s1278_s18   ;;  %s1017_s17 = sphi %s1074_s17, %s1277_s17  }
  0x14   : > { %s34_s24 = sadd.s32 1, %s1033_s20  ;;  %s69_s25 = sadd.s32 1, %s1025_s0 }
  0x15   : > { %p36_p5 = scmp.ge.s32.totalorder %s34_s24, 2  ;;  %p79_p6 = scmp.ne.s32.totalorder %s1025_s0, %s1021_s18 }
  0x16   : > { %p80_p7 = scmp.eq.s32.totalorder %s711_s22, 1  ;;  %p85_p8 = scmp.ne.s32.totalorder %s1021_s18, %s1017_s17 }
  0x17   : > { %s1283_s24 = smov (%p36_p5, %s34_s24), 0  ;;  %p86_p10 = scmp.eq.s32.totalorder %s712_s23, 1 }
  0x18   : > { %p1114_p9 = por %p80_p7, %p79_p6  ;;  %s64_s27 = ssub.s32 %s1033_s20, %s1283_s24 }
  0x19   : > { %p715_p11 = scmp.ge.s32.totalorder %s1037_s21, 1  ;;  %p67_p12 = scmp.eq.s32.totalorder %s64_s27, 0 }
  0x1a   : > { %p1121_p13 = por %p86_p10, %p85_p8  ;;  %p111_p0 = scmp.lt.s32.totalorder %s1037_s21, 3 }
  0x1b   : > { %s1127_s29 = scalar_select %p67_p12, %s1025_s0, %s69_s25  }
  0x1c   : > { %p112_p1 = pnand %p715_p11, %p111_p0 }
  0x1d   : > { %s127_s30 = sand.u32 (!%p112_p1), 1, %s1021_s18   ;;  %s1039_s6 = smov (!%p112_p1), 0  }
  0x1e   : > { %115 = sbr.rel (%p112_p1) target bundleno = 329 (0x149), region = 24  ;;  %s716_s4 = sshll.u32 (!%p112_p1), %s127_s30, 8 }
  0x1f   : > { %s1132_s5 = scalar_lea.vmem (!%p112_p1), [#allocation6], %s716_s4 }
  0x25 LB: >> { %s717_s7 = sshll.u32 %s1029_s19, 8  ;;  %s149_s13 = scalar_lea.vmem [#allocation2], %s1041_s6  ;;  %s1041_s6 = sphi %s1039_s6, %s144_s6  }
  0x26   : >> { %s146_s8 = sadd.s32 %s1041_s6, %s717_s7 }
  0x27   : >> { %s147_s9 = sld [smem:[#allocation5 + %s146_s8]] }
  0x2d   : >> { %s148_s12 = scalar_lea.vmem %s1272_s1, %s147_s9 }
  0x2e   : >> { %v167_v0 = vld [vmem:[%s148_s12] sm:$0x1] }
  0x2f   : >> { %168 = vst [vmem:[%s149_s13] sm:$0x1] %v167_v0 }
  0x30   : >> { %193 = vsyncadd [#allocation3], 16  ;;  %s144_s6 = sadd.s32 1, %s1041_s6  }
  0x31   : >> { %p141_p2 = scmp.ge.s32.totalorder %s144_s6, 256  }
  0x32   : > { %s1043_s14 = smov (%p141_p2), 0  }
  0x33   : > { %143 = sbr.rel (!%p141_p2) target bundleno = 37 (0x25), region = 119 }
  0x3a LB: >> { %1009 = dma.done.wait [#allocation3], 16  ;;  %s1045_s14 = sphi %s1043_s14, %s199_s14  }
  0x3b   : >> { %1010 = vsyncadd [#allocation3], 4294967280  ;;  %s199_s14 = sadd.s32 1, %s1045_s14  }
  0x3c   : >> { %p196_p3 = scmp.ge.s32.totalorder %s199_s14, 256  }
  0x3d   : > { %v235_v1 = vld [vmem:[%s1273_s2] sm:$0xff] (%p196_p3)  ;;  %v236_v2 = vld [vmem:[%s1273_s2 + $0x8] sm:$0xff] (%p196_p3)  ;;  %v237_v3 = vld [vmem:[%s1273_s2 + $0x10] sm:$0xff] (%p196_p3)  ;;  %vm239_vm0 = vcmask (%p196_p3), 261120   ;;  %s756_s7 = sshll.u32 (%p196_p3), %s1029_s19, 12  ;;  %s608_s8 = sshll.u32 (%p196_p3), %s1132_s5, 4  ;;  %s1217_s8 = int_to_ptr.vmem [resolvable:$true] %s608_s8 }
  0x3e   : > { %198 = sbr.rel (!%p196_p3) target bundleno = 58 (0x3a), region = 130  ;;  %v849_v4 = vpack.c.bf16 (%p196_p3), %v236_v2, %v235_v1  ;;  %v238_v5 = vld [vmem:[%s1273_s2 + $0x18] sm:$0xff] (%p196_p3)  ;;  %v203_v6 = vld [vmem:[#allocation2] sm:$0xff] (%p196_p3)  ;;  %v204_v9 = vld [vmem:[#allocation2 + $0x8] sm:$0xff] (%p196_p3)  ;;  %s1215_s11 = scalar_lea.hbm (%p196_p3), %s1274_s3, %s756_s7 }
  0x3f   : > { %v219_v7 = vld [vmem:[#allocation2 + $0x80] sm:$0xff] (%p196_p3)  ;;  %v853_v8 = vpack.c.bf16 (%p196_p3), %v238_v5, %v237_v3  ;;  %801 = vmatprep.mubr.msk.f32.mxu0 (%p196_p3), %vm239_vm0, %v203_v6  ;;  %v220_v10 = vld [vmem:[#allocation2 + $0x88] sm:$0xff] (%p196_p3)  ;;  %v205_v11 = vld [vmem:[#allocation2 + $0x10] sm:$0xff] (%p196_p3)  ;;  %s1225_s19 = scalar_lea.sflag (%p196_p3), [#allocation7], %s127_s30  ;;  %s947_s12 = scalar_lea.vmem (%p196_p3), %s1217_s8, 4096 }
  0x40   : > { %825 = vmatprep.mubr.msk.f32.mxu1 (%p196_p3), %vm239_vm0, %v219_v7  ;;  %850 = vmatprep.subr.bf16.mxu0 (%p196_p3), %v849_v4  ;;  %v221_v12 = vld [vmem:[#allocation2 + $0x90] sm:$0xff] (%p196_p3)  ;;  %v206_v13 = vld [vmem:[#allocation2 + $0x18] sm:$0xff] (%p196_p3)  ;;  %v207_v15 = vld [vmem:[#allocation2 + $0x20] sm:$0xff] (%p196_p3)  ;;  %p948_p4 = scmp.ne.s32.totalorder (%p196_p3), %s1217_s8, %s947_s12  ;;  %s1048_s13 = smov (%p196_p3), [#allocation6]  }
  0x41   : > { %857 = vmatprep.subr.bf16.mxu1 (%p196_p3), %v849_v4  ;;  %852 = vmatpush3.bf16.msra.mxu0 (%p196_p3), %v849_v4  ;;  %v222_v14 = vld [vmem:[#allocation2 + $0x98] sm:$0xff] (%p196_p3)  ;;  %v223_v16 = vld [vmem:[#allocation2 + $0xa0] sm:$0xff] (%p196_p3)  ;;  %v208_v17 = vld [vmem:[#allocation2 + $0x28] sm:$0xff] (%p196_p3)  ;;  %s951_s14 = sshll.u32 (%p196_p3), %s1048_s13, 4  ;;  %s952_s14 = int_to_ptr.vmem [resolvable:$false] %s951_s14 }
  0x42   : > { %859 = vmatpush3.bf16.msra.mxu1 (%p196_p3), %v849_v4  ;;  %854 = vmatprep.subr.bf16.mxu0 (%p196_p3), %v853_v8  ;;  %v224_v18 = vld [vmem:[#allocation2 + $0xa8] sm:$0xff] (%p196_p3)  ;;  %v209_v19 = vld [vmem:[#allocation2 + $0x30] sm:$0xff] (%p196_p3)  ;;  %v210_v21 = vld [vmem:[#allocation2 + $0x38] sm:$0xff] (%p196_p3)  ;;  %p949_p5 = pnand (%p196_p3), %p948_p4, %p1114_p9  ;;  %s953_s15 = scalar_lea.vmem (%p196_p3), %s952_s14, 8192 }
  0x43   : > { %858 = vmatprep.subr.bf16.mxu1 (%p196_p3), %v853_v8  ;;  %v225_v20 = vld [vmem:[#allocation2 + $0xb0] sm:$0xff] (%p196_p3)  ;;  %v226_v22 = vld [vmem:[#allocation2 + $0xb8] sm:$0xff] (%p196_p3)  ;;  %v211_v23 = vld [vmem:[#allocation2 + $0x40] sm:$0xff] (%p196_p3)  ;;  %p954_p7 = scmp.lt.s32.totalorder (%p196_p3), %s1217_s8, %s952_s14  ;;  %p955_p8 = scmp.lt.s32.totalorder (%p196_p3), %s953_s15, %s947_s12 }
  0x44   : > { %v227_v24 = vld [vmem:[#allocation2 + $0xc0] sm:$0xff] (%p196_p3)  ;;  %v212_v25 = vld [vmem:[#allocation2 + $0x48] sm:$0xff] (%p196_p3)  ;;  %v213_v27 = vld [vmem:[#allocation2 + $0x50] sm:$0xff] (%p196_p3)  ;;  %p950_p6 = pneg (%p196_p3), %p949_p5 }
  0x45   : > { %856 = vmatpush3.bf16.msra.mxu0 %v853_v8  ;;  %v228_v26 = vld [vmem:[#allocation2 + $0xc8] sm:$0xff]  ;;  %v229_v28 = vld [vmem:[#allocation2 + $0xd0] sm:$0xff]  ;;  %v214_v29 = vld [vmem:[#allocation2 + $0x58] sm:$0xff]  ;;  %p956_p10 = por %p955_p8, %p954_p7 }
  0x46   : > { %860 = vmatpush3.bf16.msra.mxu1 %v853_v8  ;;  %v230_v30 = vld [vmem:[#allocation2 + $0xd8] sm:$0xff]  ;;  %v215_v31 = vld [vmem:[#allocation2 + $0x60] sm:$0xff]  ;;  %v216_v33 = vld [vmem:[#allocation2 + $0x68] sm:$0xff] }
  0x47   : > { %v231_v32 = vld [vmem:[#allocation2 + $0xe0] sm:$0xff]  ;;  %v232_v34 = vld [vmem:[#allocation2 + $0xe8] sm:$0xff]  ;;  %v217_v35 = vld [vmem:[#allocation2 + $0x70] sm:$0xff]  ;;  %p957_p11 = pnand %p956_p10, %p950_p6 }
  0x48   : > { %802 = vmatmul.mubr.msk.f32.vlgmr.msra.gmra.mrb[0].mxu0 %vm239_vm0, %v204_v9  ;;  %v233_v36 = vld [vmem:[#allocation2 + $0xf0] sm:$0xff]  ;;  %v218_v37 = vld [vmem:[#allocation2 + $0x78] sm:$0xff] }
  0x49   : > { %826 = vmatmul.mubr.msk.f32.vlgmr.msra.gmra.mrb[0].mxu1 %vm239_vm0, %v220_v10  ;;  %804 = vmatprep.mubr.msk.f32.mxu0 %vm239_vm0, %v205_v11  ;;  %v234_v38 = vld [vmem:[#allocation2 + $0xf8] sm:$0xff] }
  0x4a   : > { %828 = vmatprep.mubr.msk.f32.mxu1 %vm239_vm0, %v221_v12 }
  0x4c   : > { %805 = vmatmul.mubr.msk.f32.gmra.mrb[2].mxu0 %vm239_vm0, %v206_v13 }
  0x4d   : > { %829 = vmatmul.mubr.msk.f32.gmra.mrb[2].mxu1 %vm239_vm0, %v222_v14  ;;  %807 = vmatprep.mubr.msk.f32.mxu0 %vm239_vm0, %v207_v15 }
  0x4e   : > { %831 = vmatprep.mubr.msk.f32.mxu1 %vm239_vm0, %v223_v16 }
  0x50   : > { %808 = vmatmul.mubr.msk.f32.gmra.mrb[4].mxu0 %vm239_vm0, %v208_v17 }
  0x51   : > { %832 = vmatmul.mubr.msk.f32.gmra.mrb[4].mxu1 %vm239_vm0, %v224_v18  ;;  %810 = vmatprep.mubr.msk.f32.mxu0 %vm239_vm0, %v209_v19 }
  0x52   : > { %834 = vmatprep.mubr.msk.f32.mxu1 %vm239_vm0, %v225_v20 }
  0x54   : > { %811 = vmatmul.mubr.msk.f32.gmra.mrb[6].mxu0 %vm239_vm0, %v210_v21 }
  0x55   : > { %835 = vmatmul.mubr.msk.f32.gmra.mrb[6].mxu1 %vm239_vm0, %v226_v22  ;;  %813 = vmatprep.mubr.msk.f32.mxu0 %vm239_vm0, %v211_v23 }
  0x56   : > { %837 = vmatprep.mubr.msk.f32.mxu1 %vm239_vm0, %v227_v24 }
  0x58   : > { %814 = vmatmul.mubr.msk.f32.gmra.mrb[8].mxu0 %vm239_vm0, %v212_v25 }
  0x59   : > { %838 = vmatmul.mubr.msk.f32.gmra.mrb[8].mxu1 %vm239_vm0, %v228_v26  ;;  %816 = vmatprep.mubr.msk.f32.mxu0 %vm239_vm0, %v213_v27 }
  0x5a   : > { %840 = vmatprep.mubr.msk.f32.mxu1 %vm239_vm0, %v229_v28 }
  0x5c   : > { %817 = vmatmul.mubr.msk.f32.gmra.mrb[10].mxu0 %vm239_vm0, %v214_v29 }
  0x5d   : > { %841 = vmatmul.mubr.msk.f32.gmra.mrb[10].mxu1 %vm239_vm0, %v230_v30  ;;  %819 = vmatprep.mubr.msk.f32.mxu0 %vm239_vm0, %v215_v31 }
  0x5e   : > { %843 = vmatprep.mubr.msk.f32.mxu1 %vm239_vm0, %v231_v32 }
  0x60   : > { %820 = vmatmul.mubr.msk.f32.gmra.mrb[12].mxu0 %vm239_vm0, %v216_v33 }
  0x61   : > { %844 = vmatmul.mubr.msk.f32.gmra.mrb[12].mxu1 %vm239_vm0, %v232_v34  ;;  %822 = vmatprep.mubr.msk.f32.mxu0 %vm239_vm0, %v217_v35 }
  0x62   : > { %846 = vmatprep.mubr.msk.f32.mxu1 %vm239_vm0, %v233_v36 }
  0x64   : > { %823 = vmatmul.mubr.msk.f32.gmra.mrb[14].mxu0 %vm239_vm0, %v218_v37 }
  0x65   : > { %847 = vmatmul.mubr.msk.f32.gmra.mrb[14].mxu1 %vm239_vm0, %v234_v38 }
 0x11b   : > { %v803_v39 = vpop.f32.mrb[0].mxu0 }
 0x11c   : > { %v827_v40 = vpop.f32.mrb[0].mxu1  ;;  %562 = vst [vmem:[%s1132_s5 + $0x8] sm:$0xff] %v803_v39  ;;  %v402_v41 = vpop.f32.mrb[1].mxu0 }
 0x11d   : > { %578 = vst [vmem:[%s1132_s5 + $0x88] sm:$0xff] %v827_v40  ;;  %v482_v42 = vpop.f32.mrb[1].mxu1  ;;  %561 = vst [vmem:[%s1132_s5] sm:$0xff] %v402_v41 }
 0x11e   : > { %577 = vst [vmem:[%s1132_s5 + $0x80] sm:$0xff] %v482_v42 }
 0x11f   : > { %v806_v43 = vpop.f32.mrb[2].mxu0 }
 0x120   : > { %v830_v44 = vpop.f32.mrb[2].mxu1  ;;  %564 = vst [vmem:[%s1132_s5 + $0x18] sm:$0xff] %v806_v43  ;;  %v412_v45 = vpop.f32.mrb[3].mxu0 }
 0x121   : > { %580 = vst [vmem:[%s1132_s5 + $0x98] sm:$0xff] %v830_v44  ;;  %v492_v46 = vpop.f32.mrb[3].mxu1  ;;  %563 = vst [vmem:[%s1132_s5 + $0x10] sm:$0xff] %v412_v45 }
 0x122   : > { %579 = vst [vmem:[%s1132_s5 + $0x90] sm:$0xff] %v492_v46 }
 0x123   : > { %v809_v47 = vpop.f32.mrb[4].mxu0 }
 0x124   : > { %v833_v48 = vpop.f32.mrb[4].mxu1  ;;  %566 = vst [vmem:[%s1132_s5 + $0x28] sm:$0xff] %v809_v47  ;;  %v422_v49 = vpop.f32.mrb[5].mxu0 }
 0x125   : > { %582 = vst [vmem:[%s1132_s5 + $0xa8] sm:$0xff] %v833_v48  ;;  %v502_v50 = vpop.f32.mrb[5].mxu1  ;;  %565 = vst [vmem:[%s1132_s5 + $0x20] sm:$0xff] %v422_v49 }
 0x126   : > { %581 = vst [vmem:[%s1132_s5 + $0xa0] sm:$0xff] %v502_v50 }
 0x127   : > { %v812_v51 = vpop.f32.mrb[6].mxu0 }
 0x128   : > { %v836_v52 = vpop.f32.mrb[6].mxu1  ;;  %568 = vst [vmem:[%s1132_s5 + $0x38] sm:$0xff] %v812_v51  ;;  %v432_v53 = vpop.f32.mrb[7].mxu0 }
 0x129   : > { %584 = vst [vmem:[%s1132_s5 + $0xb8] sm:$0xff] %v836_v52  ;;  %v512_v54 = vpop.f32.mrb[7].mxu1  ;;  %567 = vst [vmem:[%s1132_s5 + $0x30] sm:$0xff] %v432_v53 }
 0x12a   : > { %583 = vst [vmem:[%s1132_s5 + $0xb0] sm:$0xff] %v512_v54 }
 0x12b   : > { %v815_v55 = vpop.f32.mrb[8].mxu0 }
 0x12c   : > { %v839_v56 = vpop.f32.mrb[8].mxu1  ;;  %570 = vst [vmem:[%s1132_s5 + $0x48] sm:$0xff] %v815_v55  ;;  %v442_v57 = vpop.f32.mrb[9].mxu0 }
 0x12d   : > { %586 = vst [vmem:[%s1132_s5 + $0xc8] sm:$0xff] %v839_v56  ;;  %v522_v58 = vpop.f32.mrb[9].mxu1  ;;  %569 = vst [vmem:[%s1132_s5 + $0x40] sm:$0xff] %v442_v57 }
 0x12e   : > { %585 = vst [vmem:[%s1132_s5 + $0xc0] sm:$0xff] %v522_v58 }
 0x12f   : > { %v818_v59 = vpop.f32.mrb[10].mxu0 }
 0x130   : > { %v842_v60 = vpop.f32.mrb[10].mxu1  ;;  %572 = vst [vmem:[%s1132_s5 + $0x58] sm:$0xff] %v818_v59  ;;  %v452_v61 = vpop.f32.mrb[11].mxu0 }
 0x131   : > { %588 = vst [vmem:[%s1132_s5 + $0xd8] sm:$0xff] %v842_v60  ;;  %v532_v62 = vpop.f32.mrb[11].mxu1  ;;  %571 = vst [vmem:[%s1132_s5 + $0x50] sm:$0xff] %v452_v61 }
 0x132   : > { %587 = vst [vmem:[%s1132_s5 + $0xd0] sm:$0xff] %v532_v62 }
 0x133   : > { %v821_v63 = vpop.f32.mrb[12].mxu0 }
 0x134   : > { %v845_v0 = vpop.f32.mrb[12].mxu1  ;;  %574 = vst [vmem:[%s1132_s5 + $0x68] sm:$0xff] %v821_v63  ;;  %v462_v1 = vpop.f32.mrb[13].mxu0 }
 0x135   : > { %590 = vst [vmem:[%s1132_s5 + $0xe8] sm:$0xff] %v845_v0  ;;  %v542_v2 = vpop.f32.mrb[13].mxu1  ;;  %573 = vst [vmem:[%s1132_s5 + $0x60] sm:$0xff] %v462_v1 }
 0x136   : > { %589 = vst [vmem:[%s1132_s5 + $0xe0] sm:$0xff] %v542_v2 }
 0x137   : > { %v824_v3 = vpop.f32.mrb[14].mxu0 }
 0x138   : > { %v848_v4 = vpop.f32.mrb[14].mxu1  ;;  %576 = vst [vmem:[%s1132_s5 + $0x78] sm:$0xff] %v824_v3  ;;  %v472_v5 = vpop.f32.mrb[15].mxu0 }
 0x139   : > { %592 = vst [vmem:[%s1132_s5 + $0xf8] sm:$0xff] %v848_v4  ;;  %v552_v6 = vpop.f32.mrb[15].mxu1  ;;  %575 = vst [vmem:[%s1132_s5 + $0x70] sm:$0xff] %v472_v5 }
 0x13a   : > { %591 = vst [vmem:[%s1132_s5 + $0xf0] sm:$0xff] %v552_v6 }
 0x13b   : > { %960 = shalt.err (!%p957_p11)
}
 0x13c   : > { %s961_s30 = scalar_lea.hbm %s1215_s11, 4096  ;;  %s965_s22 = scalar_lea.hbm %s1274_s3, 8192 }
 0x13d   : > { %p962_p12 = scmp.ne.s32.totalorder %s1215_s11, %s961_s30  ;;  %p966_p2 = scmp.lt.u32.totalorder %s1215_s11, %s1274_s3 }
 0x13e   : > { %p967_p3 = scmp.lt.u32.totalorder %s965_s22, %s961_s30  ;;  %p969_p5 = scmp.lt.u32.totalorder %s961_s30, %s1215_s11 }
 0x13f   : > { %p963_p0 = pnand %p962_p12, %p1114_p9 }
 0x140   : > { %p968_p4 = por %p967_p3, %p966_p2 }
 0x141   : > { %p964_p1 = pneg %p963_p0 }
 0x142   : > { %p970_p6 = por %p969_p5, %p968_p4 }
 0x144   : > { %p971_p7 = pnand %p970_p6, %p964_p1 }
 0x146   : > { %974 = shalt.err (!%p971_p7)
}
 0x147   : > { %s1049_s27 = smov 128   ;;  %s1050_s4 = smov 8  }
 0x148   : > { %861 = dma.vmem_to_hbm [thread:$0]  (%p1114_p9), %s1217_s8, 4096, %s1215_s11, %s1225_s19, %s1049_s27, %s1049_s27, %s1050_s4  }
 0x149 PF: > { %p867_p8 = scmp.ge.s32.totalorder %s1037_s21, 2  ;;  %s623_s6 = sand.u32 1, %s1017_s17  }
 0x14a   : > { %s624_s7 = scalar_lea.sflag [#allocation7], %s623_s6 }
 0x14b   : > { %p864_p10 = pnand %p867_p8, %p1121_p13 }
 0x14d   : > { %1012 = dma.done.wait (!%p864_p10), %s624_s7, 4096  }
 0x14e   : > { %1014 = vsyncadd (!%p864_p10), %s624_s7, 4294963200  ;;  %s22_s21 = sadd.s32 1, %s1037_s21   ;;  %s1277_s17 = smov %s1021_s18 }
 0x14f   : > { %p19_p11 = scmp.ge.s32.totalorder %s22_s21, 4   ;;  %s1278_s18 = smov %s1025_s0 }
 0x150   : > { %s1279_s0 = smov %s1127_s29  ;;  %s1280_s19 = smov %s1033_s20 }
 0x151   : > { %s1281_s20 = smov %s1283_s24  ;;  %21 = sbr.rel (!%p19_p11) target bundleno = 19 (0x13), region = 141 }
 0x158   :  { %629 = vsyncpa [#allocation7], 1 }
 0x159   :  { %631 = vsyncpa [#allocation7 + $0x1], 1 }
 0x15a   :  { %632 = vsyncmov [#allocation3] }
 0x15d   :  { %s633_s26 = vpop.sfrf %632 }
 0x15e   :  { %p755_p9 = scmp.ne.s32.totalorder %s633_s26, 0 }
 0x160   :  { %637 = shalt.err (%p755_p9)  }

</bundles_post_ra>
